<compile_context>
chip_gen: v6e
topology: v6e:2x2x1
jax: 0.10.0
libtpu: 0.0.40
codegen_flags: <defaults>
</compile_context>

<pallas_src>
import math
import functools

import numpy as np
import jax
import jax.numpy as jnp
from jax.experimental import pallas as pl
from jax.experimental.pallas import tpu as pltpu


def _vmem_limit_bytes():
    """~3/4 of physical VMEM (96 MiB on v5e/v6e, 48 MiB on v7x), capped at 100 MiB."""
    try:
        cap = pltpu.get_tpu_info().vmem_capacity_bytes
    except Exception:
        cap = 128 * 1024 * 1024
    return int(min(100 * 1024 * 1024, cap * 3 // 4))


def _seq_tile(s, target):
    """Largest multiple-of-8 divisor of s that is <= target (or s itself)."""
    if s <= target:
        return s
    t = (target // 8) * 8
    while t >= 8:
        if s % t == 0:
            return t
        t -= 8
    # TODO(synk): prime / non-8-divisible sequence lengths fall back to one full-sequence
    # tile; a padded+masked path would bound VMEM for long awkward S.
    return s


# --------------------------------------------------------------------------------------
# Kernel 1: QKV projection. One (tm, D_in) @ (D_in, 3E) matmul per sequence tile;
# Q/K/V emitted head-major as (B, H, S, head_dim).
# --------------------------------------------------------------------------------------
def qkv_proj_kernel(x_ref, w_ref, b_ref, q_ref, k_ref, v_ref, *, num_head, head_dim):
    # x_ref: (1, ts, D_in) f32 | w_ref: (D_in, 3E) bf16 | b_ref: (1, 3E) f32
    # q/k/v_ref: (1, H, ts, head_dim) bf16
    embed = num_head * head_dim
    x = x_ref[0].astype(jnp.bfloat16)
    acc = jnp.dot(x, w_ref[...], preferred_element_type=jnp.float32)   # (ts, 3E) f32
    acc = acc + b_ref[...]
    # Split into head-major slabs once per tile (relayout cost paid here, not per kv step).
    for idx, o_ref in enumerate((q_ref, k_ref, v_ref)):
        base = idx * embed
        for h in range(num_head):
            lo = base + h * head_dim
            o_ref[0, h] = acc[:, lo:lo + head_dim].astype(o_ref.dtype)


# --------------------------------------------------------------------------------------
# Kernel 2: flash-style attention (online softmax, f32 stats) + fused output projection.
# --------------------------------------------------------------------------------------
def attn_kernel(q_ref, k_ref, v_ref, wo_ref, bo_ref, out_ref,
                m_sc, l_sc, acc_sc, stage_sc, *, num_head, head_dim):
    # q_ref: (1, H, tq, hd) bf16 ; k_ref/v_ref: (1, H, tk, hd) bf16
    # wo_ref: (E, E) bf16 (pre-transposed) ; bo_ref: (1, E) f32 ; out_ref: (1, tq, E)
    # scratch: m/l (H, tq, 1) f32, acc (H, tq, hd) f32, stage (tq, E) bf16
    ki = pl.program_id(2)

    @pl.when(ki == 0)
    def _init():
        m_sc[...] = jnp.full_like(m_sc, -jnp.inf)
        l_sc[...] = jnp.zeros_like(l_sc)
        acc_sc[...] = jnp.zeros_like(acc_sc)

    for h in range(num_head):                 # leading-dim views: no lane slicing
        qh = q_ref[0, h]                      # (tq, hd)
        kh = k_ref[0, h]                      # (tk, hd)
        vh = v_ref[0, h]                      # (tk, hd)
        # 1/sqrt(head_dim) is folded into the Q projection weights; contraction on the
        # last dim of both operands (no k.T relayout).
        s = jax.lax.dot_general(
            qh, kh, dimension_numbers=(((1,), (1,)), ((), ())),
            preferred_element_type=jnp.float32)                          # (tq, tk) f32
        m_prev = m_sc[h]
        m_new = jnp.maximum(m_prev, jnp.max(s, axis=-1, keepdims=True))
        alpha = jnp.exp(m_prev - m_new)
        p = jnp.exp(s - m_new)
        l_sc[h] = alpha * l_sc[h] + jnp.sum(p, axis=-1, keepdims=True)
        acc_sc[h] = alpha * acc_sc[h] + jnp.dot(
            p.astype(jnp.bfloat16), vh, preferred_element_type=jnp.float32)
        m_sc[h] = m_new

    @pl.when(ki == pl.num_programs(2) - 1)
    def _finalize():
        # Normalize each head into one contiguous (tq, E) staging buffer, then a single
        # full-K output-projection matmul.
        for h in range(num_head):
            inv_l = pl.reciprocal(l_sc[h], approx=True)
            stage_sc[:, h * head_dim:(h + 1) * head_dim] = (
                acc_sc[h] * inv_l).astype(stage_sc.dtype)
        o = jnp.dot(stage_sc[...], wo_ref[...], preferred_element_type=jnp.float32)
        out_ref[0] = (o + bo_ref[...]).astype(out_ref.dtype)


# --------------------------------------------------------------------------------------
# Wrapper
# --------------------------------------------------------------------------------------
def multihead_attention(x, wqkv, bqkv, wo, bo, *, num_head,
                        q_tile=512, kv_tile=512, proj_tile=512):
    """x: (B, S, D_in); wqkv: (3E, D_in), bqkv: (3E,) torch Linear layout; wo: (E, E)."""
    B, S, D_in = x.shape
    E3 = wqkv.shape[0]
    E = E3 // 3
    head_dim = E // num_head
    vmem_limit = _vmem_limit_bytes()

    # ---- weight glue ------------------------------------------------------------------
    # Permute per-head-interleaved qkv output features [q0 k0 v0 | q1 k1 v1 | ...] into
    # head-major slabs [Q(all heads) | K | V]; fold 1/sqrt(head_dim) into the Q slab.
    which = np.arange(3)[:, None, None]
    heads = np.arange(num_head)[None, :, None]
    dims = np.arange(head_dim)[None, None, :]
    perm = (heads * 3 * head_dim + which * head_dim + dims).reshape(-1)

    scale = 1.0 / math.sqrt(head_dim)
    col_scale = jnp.concatenate(
        [jnp.full((E,), scale, jnp.float32), jnp.ones((2 * E,), jnp.float32)])
    w_all = (wqkv[perm].T.astype(jnp.float32) * col_scale).astype(jnp.bfloat16)  # (D_in, 3E)
    b_all = (bqkv[perm].astype(jnp.float32) * col_scale).reshape(1, 3 * E)       # (1, 3E)
    wo_t = wo.T.astype(jnp.bfloat16)                                             # (E, E)
    bo2 = bo.reshape(1, E).astype(jnp.float32)                                   # (1, E)

    # ---- kernel 1: QKV projection, head-major outputs ---------------------------------
    # TODO(synk): for very large D_in/E (e.g. 4096) the resident (D_in, 3E) bf16 weight
    # should additionally be tiled along its output axis so it fits v7x's 64 MiB VMEM.
    ts = _seq_tile(S, proj_tile)
    qkv_sds = jax.ShapeDtypeStruct((B, num_head, S, head_dim), jnp.bfloat16)
    q, k, v = pl.pallas_call(
        functools.partial(qkv_proj_kernel, num_head=num_head, head_dim=head_dim),
        out_shape=(qkv_sds, qkv_sds, qkv_sds),
        grid_spec=pltpu.PrefetchScalarGridSpec(
            num_scalar_prefetch=0,
            grid=(B, S // ts),
            in_specs=[
                pl.BlockSpec((1, ts, D_in), lambda b, si: (b, si, 0)),
                pl.BlockSpec((D_in, 3 * E), lambda b, si: (0, 0),
                             pipeline_mode=pl.Buffered(1)),
                pl.BlockSpec((1, 3 * E), lambda b, si: (0, 0),
                             pipeline_mode=pl.Buffered(1)),
            ],
            out_specs=[
                pl.BlockSpec((1, num_head, ts, head_dim), lambda b, si: (b, 0, si, 0)),
                pl.BlockSpec((1, num_head, ts, head_dim), lambda b, si: (b, 0, si, 0)),
                pl.BlockSpec((1, num_head, ts, head_dim), lambda b, si: (b, 0, si, 0)),
            ],
        ),
        compiler_params=pltpu.CompilerParams(
            dimension_semantics=("parallel", "parallel"),
            vmem_limit_bytes=vmem_limit),
    )(x, w_all, b_all)

    # ---- kernel 2: flash attention + fused output projection --------------------------
    tq = _seq_tile(S, q_tile)
    tk = _seq_tile(S, kv_tile)
    kernel = functools.partial(attn_kernel, num_head=num_head, head_dim=head_dim)

    return pl.pallas_call(
        kernel,
        out_shape=jax.ShapeDtypeStruct((B, S, E), x.dtype),
        grid_spec=pltpu.PrefetchScalarGridSpec(
            num_scalar_prefetch=0,
            grid=(B, S // tq, S // tk),
            in_specs=[
                pl.BlockSpec((1, num_head, tq, head_dim),
                             lambda b, qi, ki: (b, 0, qi, 0)),
                pl.BlockSpec((1, num_head, tk, head_dim),
                             lambda b, qi, ki: (b, 0, ki, 0)),
                pl.BlockSpec((1, num_head, tk, head_dim),
                             lambda b, qi, ki: (b, 0, ki, 0)),
                pl.BlockSpec((E, E), lambda b, qi, ki: (0, 0),
                             pipeline_mode=pl.Buffered(1)),
                pl.BlockSpec((1, E), lambda b, qi, ki: (0, 0),
                             pipeline_mode=pl.Buffered(1)),
            ],
            out_specs=pl.BlockSpec((1, tq, E), lambda b, qi, ki: (b, qi, 0)),
            scratch_shapes=[
                pltpu.VMEM((num_head, tq, 1), jnp.float32),          # running max
                pltpu.VMEM((num_head, tq, 1), jnp.float32),          # running sum
                pltpu.VMEM((num_head, tq, head_dim), jnp.float32),   # unnormalized acc
                pltpu.VMEM((tq, E), jnp.bfloat16),                   # o-proj staging
            ],
        ),
        compiler_params=pltpu.CompilerParams(
            dimension_semantics=("parallel", "parallel", "arbitrary"),
            vmem_limit_bytes=vmem_limit),
    )(q, k, v, wo_t, bo2)


# --------------------------------------------------------------------------------------
# Reference + test
# --------------------------------------------------------------------------------------
def reference_mha(x, wqkv, bqkv, wo, bo, *, num_head):
    """Pure-JAX f32 reference reproducing the PyTorch module's forward."""
    B, S, D_in = x.shape
    E = wo.shape[0]
    head_dim = E // num_head
    qkv = x @ wqkv.T + bqkv                                  # (B, S, 3E)
    qkv = qkv.reshape(B, S, num_head, 3 * head_dim)
    qkv = jnp.transpose(qkv, (0, 2, 1, 3))                   # (B, H, S, 3*hd)
    q, k, v = jnp.split(qkv, 3, axis=-1)
    logits = jnp.einsum("bhqd,bhkd->bhqk", q, k) / math.sqrt(head_dim)
    attn = jax.nn.softmax(logits, axis=-1)
    vals = jnp.einsum("bhqk,bhkd->bhqd", attn, v)
    vals = jnp.transpose(vals, (0, 2, 1, 3)).reshape(B, S, E)
    return vals @ wo.T + bo


def xavier_uniform(key, shape):
    fan_out, fan_in = shape
    limit = math.sqrt(6.0 / (fan_in + fan_out))
    return jax.random.uniform(key, shape, jnp.float32, -limit, limit)


if __name__ == "__main__":
    # Small deterministic setup: batch=2, seq=8, input_dim=32, embed_dim=32, heads=4.
    B, S, input_dim, embed_dim, num_head = 2, 8, 32, 32, 4

    key = jax.random.PRNGKey(0)
    kx, kw1, kw2 = jax.random.split(key, 3)

    x = jax.random.normal(kx, (B, S, input_dim), jnp.float32)
    wqkv = xavier_uniform(kw1, (3 * embed_dim, input_dim))   # torch Linear weight layout
    bqkv = jnp.zeros((3 * embed_dim,), jnp.float32)
    wo = xavier_uniform(kw2, (embed_dim, embed_dim))
    bo = jnp.zeros((embed_dim,), jnp.float32)

    # TODO(synk): attention mask / key_padding_mask and return_attention=True are not
    # implemented (forward defaults: full bidirectional attention, output only).
    out = multihead_attention(x, wqkv, bqkv, wo, bo, num_head=num_head)
    out = jax.block_until_ready(out)

    ref = reference_mha(x, wqkv, bqkv, wo, bo, num_head=num_head)
    assert out.shape == (B, S, embed_dim)
    # bf16 MXU operands + approx reciprocal -> bf16-appropriate tolerance vs f32 reference.
    assert jnp.allclose(out, ref, atol=5e-2, rtol=5e-2), "mismatch vs reference"

    print("KERNEL_OK")
</pallas_src>

<mosaic_0001>
module attributes {stable_mosaic.version = 11 : i64} {
  func.func @qkv_proj_kernel(%arg0: i32, %arg1: i32, %arg2: memref<1x8x32xf32, #tpu.memory_space<vmem>>, %arg3: memref<32x96xbf16, #tpu.memory_space<vmem>>, %arg4: memref<1x96xf32, #tpu.memory_space<vmem>>, %arg5: memref<1x4x8x8xbf16, #tpu.memory_space<vmem>>, %arg6: memref<1x4x8x8xbf16, #tpu.memory_space<vmem>>, %arg7: memref<1x4x8x8xbf16, #tpu.memory_space<vmem>>) attributes {dimension_semantics = [#tpu.dimension_semantics<parallel>, #tpu.dimension_semantics<parallel>], iteration_bounds = array<i64: 2, 1>, scalar_prefetch = 0 : i64, scratch_operands = 0 : i64, tpu.core_type = #tpu.core_type<tc>, window_params = [{transform_indices = @transform_0, window_bounds = array<i64: 1, 8, 32>}, {pipeline_mode = #tpu.pipeline_mode<synchronous>, transform_indices = @transform_1, window_bounds = array<i64: 32, 96>}, {pipeline_mode = #tpu.pipeline_mode<synchronous>, transform_indices = @transform_2, window_bounds = array<i64: 1, 96>}, {transform_indices = @transform_3, window_bounds = array<i64: 1, 4, 8, 8>}, {transform_indices = @transform_4, window_bounds = array<i64: 1, 4, 8, 8>}, {transform_indices = @transform_5, window_bounds = array<i64: 1, 4, 8, 8>}]} {
    %c0 = arith.constant 0 : index
    %c0_0 = arith.constant 0 : index
    %c0_1 = arith.constant 0 : index
    %0 = vector.load %arg2[%c0, %c0_0, %c0_1] : memref<1x8x32xf32, #tpu.memory_space<vmem>>, vector<1x8x32xf32>
    %1 = vector.shape_cast %0 : vector<1x8x32xf32> to vector<8x32xf32>
    %2 = arith.truncf %1 : vector<8x32xf32> to vector<8x32xbf16>
    %c0_2 = arith.constant 0 : index
    %c0_3 = arith.constant 0 : index
    %3 = vector.load %arg3[%c0_2, %c0_3] : memref<32x96xbf16, #tpu.memory_space<vmem>>, vector<32x96xbf16>
    %cst = arith.constant dense<0.000000e+00> : vector<8x96xf32>
    %4 = tpu.matmul %2, %3, %cst {dimension_numbers = #tpu.dot_dimension_numbers<[1], [0], [0], [1], [0, 0, 1, 1], [], []>} : vector<8x32xbf16>, vector<32x96xbf16>, vector<8x96xf32> -> vector<8x96xf32>
    %c0_4 = arith.constant 0 : index
    %c0_5 = arith.constant 0 : index
    %5 = vector.load %arg4[%c0_4, %c0_5] : memref<1x96xf32, #tpu.memory_space<vmem>>, vector<1x96xf32>
    %6 = vector.broadcast %5 : vector<1x96xf32> to vector<8x96xf32>
    %7 = arith.addf %4, %6 : vector<8x96xf32>
    %8 = vector.extract_strided_slice %7 {offsets = [0, 0], sizes = [8, 8], strides = [1, 1]} : vector<8x96xf32> to vector<8x8xf32>
    %9 = arith.truncf %8 : vector<8x8xf32> to vector<8x8xbf16>
    %c0_6 = arith.constant 0 : index
    %c0_7 = arith.constant 0 : index
    %c0_8 = arith.constant 0 : index
    %c0_9 = arith.constant 0 : index
    %10 = vector.load %arg5[%c0_6, %c0_7, %c0_8, %c0_9] : memref<1x4x8x8xbf16, #tpu.memory_space<vmem>>, vector<1x1x8x8xbf16>
    %11 = vector.shape_cast %10 : vector<1x1x8x8xbf16> to vector<8x8xbf16>
    %12 = vector.shape_cast %9 : vector<8x8xbf16> to vector<1x1x8x8xbf16>
    tpu.vector_store %arg5[%c0_6, %c0_7, %c0_8, %c0_9], %12 {strides = array<i32>} : memref<1x4x8x8xbf16, #tpu.memory_space<vmem>>, vector<1x1x8x8xbf16>,
    %13 = vector.extract_strided_slice %7 {offsets = [0, 8], sizes = [8, 8], strides = [1, 1]} : vector<8x96xf32> to vector<8x8xf32>
    %14 = arith.truncf %13 : vector<8x8xf32> to vector<8x8xbf16>
    %c0_10 = arith.constant 0 : index
    %c1 = arith.constant 1 : index
    %c0_11 = arith.constant 0 : index
    %c0_12 = arith.constant 0 : index
    %15 = vector.load %arg5[%c0_10, %c1, %c0_11, %c0_12] : memref<1x4x8x8xbf16, #tpu.memory_space<vmem>>, vector<1x1x8x8xbf16>
    %16 = vector.shape_cast %15 : vector<1x1x8x8xbf16> to vector<8x8xbf16>
    %17 = vector.shape_cast %14 : vector<8x8xbf16> to vector<1x1x8x8xbf16>
    tpu.vector_store %arg5[%c0_10, %c1, %c0_11, %c0_12], %17 {strides = array<i32>} : memref<1x4x8x8xbf16, #tpu.memory_space<vmem>>, vector<1x1x8x8xbf16>,
    %18 = vector.extract_strided_slice %7 {offsets = [0, 16], sizes = [8, 8], strides = [1, 1]} : vector<8x96xf32> to vector<8x8xf32>
    %19 = arith.truncf %18 : vector<8x8xf32> to vector<8x8xbf16>
    %c0_13 = arith.constant 0 : index
    %c2 = arith.constant 2 : index
    %c0_14 = arith.constant 0 : index
    %c0_15 = arith.constant 0 : index
    %20 = vector.load %arg5[%c0_13, %c2, %c0_14, %c0_15] : memref<1x4x8x8xbf16, #tpu.memory_space<vmem>>, vector<1x1x8x8xbf16>
    %21 = vector.shape_cast %20 : vector<1x1x8x8xbf16> to vector<8x8xbf16>
    %22 = vector.shape_cast %19 : vector<8x8xbf16> to vector<1x1x8x8xbf16>
    tpu.vector_store %arg5[%c0_13, %c2, %c0_14, %c0_15], %22 {strides = array<i32>} : memref<1x4x8x8xbf16, #tpu.memory_space<vmem>>, vector<1x1x8x8xbf16>,
    %23 = vector.extract_strided_slice %7 {offsets = [0, 24], sizes = [8, 8], strides = [1, 1]} : vector<8x96xf32> to vector<8x8xf32>
    %24 = arith.truncf %23 : vector<8x8xf32> to vector<8x8xbf16>
    %c0_16 = arith.constant 0 : index
    %c3 = arith.constant 3 : index
    %c0_17 = arith.constant 0 : index
    %c0_18 = arith.constant 0 : index
    %25 = vector.load %arg5[%c0_16, %c3, %c0_17, %c0_18] : memref<1x4x8x8xbf16, #tpu.memory_space<vmem>>, vector<1x1x8x8xbf16>
    %26 = vector.shape_cast %25 : vector<1x1x8x8xbf16> to vector<8x8xbf16>
    %27 = vector.shape_cast %24 : vector<8x8xbf16> to vector<1x1x8x8xbf16>
    tpu.vector_store %arg5[%c0_16, %c3, %c0_17, %c0_18], %27 {strides = array<i32>} : memref<1x4x8x8xbf16, #tpu.memory_space<vmem>>, vector<1x1x8x8xbf16>,
    %28 = vector.extract_strided_slice %7 {offsets = [0, 32], sizes = [8, 8], strides = [1, 1]} : vector<8x96xf32> to vector<8x8xf32>
    %29 = arith.truncf %28 : vector<8x8xf32> to vector<8x8xbf16>
    %c0_19 = arith.constant 0 : index
    %c0_20 = arith.constant 0 : index
    %c0_21 = arith.constant 0 : index
    %c0_22 = arith.constant 0 : index
    %30 = vector.load %arg6[%c0_19, %c0_20, %c0_21, %c0_22] : memref<1x4x8x8xbf16, #tpu.memory_space<vmem>>, vector<1x1x8x8xbf16>
    %31 = vector.shape_cast %30 : vector<1x1x8x8xbf16> to vector<8x8xbf16>
    %32 = vector.shape_cast %29 : vector<8x8xbf16> to vector<1x1x8x8xbf16>
    tpu.vector_store %arg6[%c0_19, %c0_20, %c0_21, %c0_22], %32 {strides = array<i32>} : memref<1x4x8x8xbf16, #tpu.memory_space<vmem>>, vector<1x1x8x8xbf16>,
    %33 = vector.extract_strided_slice %7 {offsets = [0, 40], sizes = [8, 8], strides = [1, 1]} : vector<8x96xf32> to vector<8x8xf32>
    %34 = arith.truncf %33 : vector<8x8xf32> to vector<8x8xbf16>
    %c0_23 = arith.constant 0 : index
    %c1_24 = arith.constant 1 : index
    %c0_25 = arith.constant 0 : index
    %c0_26 = arith.constant 0 : index
    %35 = vector.load %arg6[%c0_23, %c1_24, %c0_25, %c0_26] : memref<1x4x8x8xbf16, #tpu.memory_space<vmem>>, vector<1x1x8x8xbf16>
    %36 = vector.shape_cast %35 : vector<1x1x8x8xbf16> to vector<8x8xbf16>
    %37 = vector.shape_cast %34 : vector<8x8xbf16> to vector<1x1x8x8xbf16>
    tpu.vector_store %arg6[%c0_23, %c1_24, %c0_25, %c0_26], %37 {strides = array<i32>} : memref<1x4x8x8xbf16, #tpu.memory_space<vmem>>, vector<1x1x8x8xbf16>,
    %38 = vector.extract_strided_slice %7 {offsets = [0, 48], sizes = [8, 8], strides = [1, 1]} : vector<8x96xf32> to vector<8x8xf32>
    %39 = arith.truncf %38 : vector<8x8xf32> to vector<8x8xbf16>
    %c0_27 = arith.constant 0 : index
    %c2_28 = arith.constant 2 : index
    %c0_29 = arith.constant 0 : index
    %c0_30 = arith.constant 0 : index
    %40 = vector.load %arg6[%c0_27, %c2_28, %c0_29, %c0_30] : memref<1x4x8x8xbf16, #tpu.memory_space<vmem>>, vector<1x1x8x8xbf16>
    %41 = vector.shape_cast %40 : vector<1x1x8x8xbf16> to vector<8x8xbf16>
    %42 = vector.shape_cast %39 : vector<8x8xbf16> to vector<1x1x8x8xbf16>
    tpu.vector_store %arg6[%c0_27, %c2_28, %c0_29, %c0_30], %42 {strides = array<i32>} : memref<1x4x8x8xbf16, #tpu.memory_space<vmem>>, vector<1x1x8x8xbf16>,
    %43 = vector.extract_strided_slice %7 {offsets = [0, 56], sizes = [8, 8], strides = [1, 1]} : vector<8x96xf32> to vector<8x8xf32>
    %44 = arith.truncf %43 : vector<8x8xf32> to vector<8x8xbf16>
    %c0_31 = arith.constant 0 : index
    %c3_32 = arith.constant 3 : index
    %c0_33 = arith.constant 0 : index
    %c0_34 = arith.constant 0 : index
    %45 = vector.load %arg6[%c0_31, %c3_32, %c0_33, %c0_34] : memref<1x4x8x8xbf16, #tpu.memory_space<vmem>>, vector<1x1x8x8xbf16>
    %46 = vector.shape_cast %45 : vector<1x1x8x8xbf16> to vector<8x8xbf16>
    %47 = vector.shape_cast %44 : vector<8x8xbf16> to vector<1x1x8x8xbf16>
    tpu.vector_store %arg6[%c0_31, %c3_32, %c0_33, %c0_34], %47 {strides = array<i32>} : memref<1x4x8x8xbf16, #tpu.memory_space<vmem>>, vector<1x1x8x8xbf16>,
    %48 = vector.extract_strided_slice %7 {offsets = [0, 64], sizes = [8, 8], strides = [1, 1]} : vector<8x96xf32> to vector<8x8xf32>
    %49 = arith.truncf %48 : vector<8x8xf32> to vector<8x8xbf16>
    %c0_35 = arith.constant 0 : index
    %c0_36 = arith.constant 0 : index
    %c0_37 = arith.constant 0 : index
    %c0_38 = arith.constant 0 : index
    %50 = vector.load %arg7[%c0_35, %c0_36, %c0_37, %c0_38] : memref<1x4x8x8xbf16, #tpu.memory_space<vmem>>, vector<1x1x8x8xbf16>
    %51 = vector.shape_cast %50 : vector<1x1x8x8xbf16> to vector<8x8xbf16>
    %52 = vector.shape_cast %49 : vector<8x8xbf16> to vector<1x1x8x8xbf16>
    tpu.vector_store %arg7[%c0_35, %c0_36, %c0_37, %c0_38], %52 {strides = array<i32>} : memref<1x4x8x8xbf16, #tpu.memory_space<vmem>>, vector<1x1x8x8xbf16>,
    %53 = vector.extract_strided_slice %7 {offsets = [0, 72], sizes = [8, 8], strides = [1, 1]} : vector<8x96xf32> to vector<8x8xf32>
    %54 = arith.truncf %53 : vector<8x8xf32> to vector<8x8xbf16>
    %c0_39 = arith.constant 0 : index
    %c1_40 = arith.constant 1 : index
    %c0_41 = arith.constant 0 : index
    %c0_42 = arith.constant 0 : index
    %55 = vector.load %arg7[%c0_39, %c1_40, %c0_41, %c0_42] : memref<1x4x8x8xbf16, #tpu.memory_space<vmem>>, vector<1x1x8x8xbf16>
    %56 = vector.shape_cast %55 : vector<1x1x8x8xbf16> to vector<8x8xbf16>
    %57 = vector.shape_cast %54 : vector<8x8xbf16> to vector<1x1x8x8xbf16>
    tpu.vector_store %arg7[%c0_39, %c1_40, %c0_41, %c0_42], %57 {strides = array<i32>} : memref<1x4x8x8xbf16, #tpu.memory_space<vmem>>, vector<1x1x8x8xbf16>,
    %58 = vector.extract_strided_slice %7 {offsets = [0, 80], sizes = [8, 8], strides = [1, 1]} : vector<8x96xf32> to vector<8x8xf32>
    %59 = arith.truncf %58 : vector<8x8xf32> to vector<8x8xbf16>
    %c0_43 = arith.constant 0 : index
    %c2_44 = arith.constant 2 : index
    %c0_45 = arith.constant 0 : index
    %c0_46 = arith.constant 0 : index
    %60 = vector.load %arg7[%c0_43, %c2_44, %c0_45, %c0_46] : memref<1x4x8x8xbf16, #tpu.memory_space<vmem>>, vector<1x1x8x8xbf16>
    %61 = vector.shape_cast %60 : vector<1x1x8x8xbf16> to vector<8x8xbf16>
    %62 = vector.shape_cast %59 : vector<8x8xbf16> to vector<1x1x8x8xbf16>
    tpu.vector_store %arg7[%c0_43, %c2_44, %c0_45, %c0_46], %62 {strides = array<i32>} : memref<1x4x8x8xbf16, #tpu.memory_space<vmem>>, vector<1x1x8x8xbf16>,
    %63 = vector.extract_strided_slice %7 {offsets = [0, 88], sizes = [8, 8], strides = [1, 1]} : vector<8x96xf32> to vector<8x8xf32>
    %64 = arith.truncf %63 : vector<8x8xf32> to vector<8x8xbf16>
    %c0_47 = arith.constant 0 : index
    %c3_48 = arith.constant 3 : index
    %c0_49 = arith.constant 0 : index
    %c0_50 = arith.constant 0 : index
    %65 = vector.load %arg7[%c0_47, %c3_48, %c0_49, %c0_50] : memref<1x4x8x8xbf16, #tpu.memory_space<vmem>>, vector<1x1x8x8xbf16>
    %66 = vector.shape_cast %65 : vector<1x1x8x8xbf16> to vector<8x8xbf16>
    %67 = vector.shape_cast %64 : vector<8x8xbf16> to vector<1x1x8x8xbf16>
    tpu.vector_store %arg7[%c0_47, %c3_48, %c0_49, %c0_50], %67 {strides = array<i32>} : memref<1x4x8x8xbf16, #tpu.memory_space<vmem>>, vector<1x1x8x8xbf16>,
    return
  }
  func.func @transform_0(%arg0: i32, %arg1: i32) -> (i32, i32, i32) {
    %c0_i32 = arith.constant 0 : i32
    %c0_i32_0 = arith.constant 0 : i32
    return %arg0, %arg1, %c0_i32 : i32, i32, i32
  }
  func.func @transform_1(%arg0: i32, %arg1: i32) -> (i32, i32) {
    %c0_i32 = arith.constant 0 : i32
    %c0_i32_0 = arith.constant 0 : i32
    %c0_i32_1 = arith.constant 0 : i32
    return %c0_i32, %c0_i32_0 : i32, i32
  }
  func.func @transform_2(%arg0: i32, %arg1: i32) -> (i32, i32) {
    %c0_i32 = arith.constant 0 : i32
    %c0_i32_0 = arith.constant 0 : i32
    %c0_i32_1 = arith.constant 0 : i32
    return %c0_i32, %c0_i32_0 : i32, i32
  }
  func.func @transform_3(%arg0: i32, %arg1: i32) -> (i32, i32, i32, i32) {
    %c0_i32 = arith.constant 0 : i32
    %c0_i32_0 = arith.constant 0 : i32
    %c0_i32_1 = arith.constant 0 : i32
    return %arg0, %c0_i32, %arg1, %c0_i32_0 : i32, i32, i32, i32
  }
  func.func @transform_4(%arg0: i32, %arg1: i32) -> (i32, i32, i32, i32) {
    %c0_i32 = arith.constant 0 : i32
    %c0_i32_0 = arith.constant 0 : i32
    %c0_i32_1 = arith.constant 0 : i32
    return %arg0, %c0_i32, %arg1, %c0_i32_0 : i32, i32, i32, i32
  }
  func.func @transform_5(%arg0: i32, %arg1: i32) -> (i32, i32, i32, i32) {
    %c0_i32 = arith.constant 0 : i32
    %c0_i32_0 = arith.constant 0 : i32
    %c0_i32_1 = arith.constant 0 : i32
    return %arg0, %c0_i32, %arg1, %c0_i32_0 : i32, i32, i32, i32
  }
}

</mosaic_0001>

<bundles_post_ra>
// kernel: tpu_custom_call.1
= control target key start
LH: loop header
LB: loop body
LE: loop exit
PB: predicated region body
PF: predicated region fallthrough
CT: control target
= control target key end

     0   :  { %s1330_s0 = inlined_call_operand.hbm [shape: f32[2,8,32], index: 0, kind: input, shape index: {}]   ;;  %s1331_s1 = inlined_call_operand.hbm [shape: bf16[32,96], index: 1, kind: input, shape index: {}]   ;;  %s1332_s2 = inlined_call_operand.vmem [shape: f32[1,96], index: 2, kind: input, shape index: {}]   ;;  %s1333_s3 = inlined_call_operand.hbm [shape: bf16[2,4,8,8], index: 3, kind: output, shape index: {0}]   ;;  %s1334_s4 = inlined_call_operand.hbm [shape: bf16[2,4,8,8], index: 4, kind: output, shape index: {1}]   ;;  %s1335_s5 = inlined_call_operand.hbm [shape: bf16[2,4,8,8], index: 5, kind: output, shape index: {2}]  }
   0x1   :  { %1339 = sst [smem:[#allocation16_spill]] %s1331_s1 }
   0x2   :  { %11 = vsyncpa [#allocation3], 0 }
   0x3   :  { %13 = vsyncpa [#allocation3 + $0x1], 0 }
   0x4   :  { %14 = vsyncpa [#allocation6], 0 }
   0x5   :  { %15 = vsyncpa [#allocation4], 0 }
   0x6   :  { %17 = vsyncpa [#allocation4 + $0x1], 0 }
   0x7   :  { %18 = vsyncpa [#allocation9], 0 }
   0x8   :  { %20 = vsyncpa [#allocation9 + $0x1], 0  ;;  %s1042_s18 = smov 0   ;;  %s1044_s19 = smov 0  }
   0x9   :  { %s1046_s20 = smov 0   ;;  %s1048_s21 = smov 0  }
   0xa   :  { %s1050_s22 = smov 0   ;;  %s1052_s23 = smov 0  }
   0xb LB: > { %s1073_s24 = sadd.s32 4294967295, %s989_s23   ;;  %s1336_s25 = sadd.s32 4294967294, %s989_s23   ;;  %s989_s23 = sphi %s1052_s23, %s26_s23   ;;  %s985_s22 = sphi %s1050_s22, %s1360_s22   ;;  %s981_s21 = sphi %s1048_s21, %s1359_s21   ;;  %s977_s20 = sphi %s1046_s20, %s1358_s20   ;;  %s973_s19 = sphi %s1044_s19, %s1357_s19   ;;  %s969_s18 = sphi %s1042_s18, %s1356_s18  }
   0xc   : > { %p60_p0 = scmp.ne.s32.totalorder %s973_s19, %s969_s18  ;;  %p1338_p1 = scmp.eq.s32.totalorder %s1073_s24, 0 }
   0xd   : > { %p134_p3 = scmp.eq.s32.totalorder %s1336_s25, 1  ;;  %p643_p5 = scmp.ge.s32.totalorder %s989_s23, 1 }
   0xe   : > { %p1084_p4 = por %p1338_p1, %p60_p0  ;;  %p197_p7 = scmp.lt.s32.totalorder %s989_s23, 3 }
   0xf   : > { %p1089_p6 = por %p134_p3, %p60_p0  ;;  %s991_s29 = smov [#allocation5]  }
  0x10   : > { %p1094_p8 = pnand %p643_p5, %p197_p7  ;;  %s209_s30 = sshll.u32 %s991_s29, 4  ;;  %s210_s30 = int_to_ptr.vmem [resolvable:$true] %s209_s30 }
  0x11   : > { %s1341_s27 = scalar_select %p1089_p6, 1, 0 }
  0x12   : > { %p706_p9 = pneg %p1094_p8  ;;  %s38_s7 = sadd.s32 1, %s985_s22 }
  0x13   : > { %s806_s8 = scalar_lea.vmem %s210_s30, 256  ;;  %p814_p5 = scmp.lt.s32.totalorder %s210_s30, %s210_s30 }
  0x14   : > { %p1103_p11 = pnand %p706_p9, %p1338_p1  ;;  %p807_p13 = scmp.ne.s32.totalorder %s210_s30, %s806_s8 }
  0x15   : > { %p815_p7 = scmp.lt.s32.totalorder %s806_s8, %s806_s8 }
  0x16   : > { %p797_p12 = pneg %p1103_p11 }
  0x17   : > { %p816_p2 = por %p815_p7, %p814_p5 }
  0x18   : > { %p809_p0 = pnand %p807_p13, %p797_p12 }
  0x1a   : > { %p810_p3 = pneg %p809_p0 }
  0x1c   : > { %p817_p6 = pnand %p816_p2, %p810_p3 }
  0x1e   : > { %820 = shalt.err (!%p817_p6)
}
  0x1f   : > { %s992_s9 = smov 64   ;;  %s993_s10 = smov 4  }
  0x20   : > { %s1344_s1 = sld [smem:[#allocation16_spill]]  ;;  %p40_p2 = scmp.ge.s32.totalorder %s38_s7, 2 }
  0x21   : > { %s47_s13 = sadd.s32 1, %s977_s20  ;;  %p54_p6 = scmp.ne.s32.totalorder %s977_s20, %s973_s19 }
  0x22   : > { %p55_p9 = scmp.eq.s32.totalorder %s989_s23, 0  ;;  %s1362_s7 = smov (%p40_p2, %s38_s7), 0 }
  0x23   : > { %1345 = sst [smem:[#allocation15_spill]] %s1362_s7  ;;  %p1347_p13 = scmp.eq.s32.totalorder %s1073_s24, 1 }
  0x24   : > { %p1121_p12 = por %p55_p9, %p54_p6  ;;  %s42_s16 = ssub.s32 %s985_s22, %s1362_s7 }
  0x25   : > { %p1127_p0 = por %p1347_p13, %p54_p6  ;;  %p725_p3 = scmp.lt.s32.totalorder %s989_s23, 2 }
  0x26   : > { %709 = dma.hbm_to_vmem [thread:$0]  (!%p1103_p11), %s1344_s1, 256, %s210_s30, [#allocation6], %s992_s9, %s992_s9, %s993_s10  }
  0x27   : > { %p45_p11 = scmp.eq.s32.totalorder %s42_s16, 0  ;;  %s226_s17 = sand.u32 1, %s977_s20  }
  0x28   : > { %s646_s29 = sshll.u32 %s226_s17, 3  ;;  %s647_s6 = sshll.u32 %s985_s22, 7 }
  0x29   : > { %s1136_s30 = scalar_select %p45_p11, %s977_s20, %s47_s13  }
  0x2a   : > { %s236_s10 = scalar_lea.hbm %s1330_s0, %s647_s6  ;;  %s230_s11 = scalar_lea.vmem [#allocation2], %s646_s29 }
  0x2b   : > { %s238_s12 = sshll.u32 %s230_s11, 4  ;;  %p1144_p5 = pnand %p725_p3, %p1121_p12  ;;  %s239_s12 = int_to_ptr.vmem [resolvable:$true] %s238_s12 }
  0x2c   : > { %s227_s1 = scalar_lea.sflag [#allocation3], %s226_s17  ;;  %s834_s16 = scalar_lea.vmem %s239_s12, 128 }
  0x2d   : > { %p823_p7 = pneg %p1144_p5  ;;  %p835_p2 = scmp.ne.s32.totalorder %s239_s12, %s834_s16 }
  0x2e   : > { %s994_s13 = smov [#allocation2]  }
  0x2f   : > { %p837_p6 = pnand %p835_p2, %p823_p7  ;;  %s839_s7 = sshll.u32 %s994_s13, 4  ;;  %s840_s7 = int_to_ptr.vmem [resolvable:$false] %s839_s7 }
  0x30   : > { %s841_s6 = scalar_lea.vmem %s840_s7, 256  ;;  %p842_p13 = scmp.lt.s32.totalorder %s239_s12, %s840_s7 }
  0x31   : > { %p838_p9 = pneg %p837_p6  ;;  %p843_p11 = scmp.lt.s32.totalorder %s841_s6, %s834_s16 }
  0x33   : > { %p844_p10 = por %p843_p11, %p842_p13 }
  0x35   : > { %p845_p1 = pnand %p844_p10, %p838_p9 }
  0x37   : > { %848 = shalt.err (!%p845_p1)
}
  0x38   : > { %713 = dma.hbm_to_vmem [thread:$0]  (!%p1144_p5), %s236_s10, 128, %s239_s12, %s227_s1  }
  0x39   : > { %247 = sbr.rel (%p1094_p8) target bundleno = 450 (0x1c2), region = 32  ;;  %s1155_s14 = sand.u32 (!%p1094_p8), 1, %s973_s19  }
  0x3a   : > { %s649_s17 = sshll.u32 (!%p1094_p8), %s1155_s14, 3  ;;  %s250_s29 = scalar_lea.sflag (!%p1094_p8), [#allocation3], %s1155_s14 }
  0x3b   : > { %s253_s8 = scalar_lea.vmem (!%p1094_p8), [#allocation2], %s649_s17 }
  0x3e   : > { %952 = dma.done.wait (%p1084_p4), %s250_s29, 128  }
  0x3f   : > { %954 = vsyncadd (%p1084_p4), %s250_s29, 4294967168  ;;  %p1350_p1 = scmp.eq.s32.totalorder %s1073_s24, 0 }
  0x41   : > { %956 = dma.done.wait (%p1350_p1), [#allocation6], 256   ;;  %p1351_p10 = pmov %p1350_p1 }
  0x42   : > { %v995_v0 = vmov 0.0   ;;  %vm996_vm0 = vmmov 0   ;;  %v793_v1 = vld [vmem:[#allocation5 + $0x8] sm:$0xff]   ;;  %v794_v2 = vld [vmem:[#allocation5] sm:$0xff]   ;;  %v295_v3 = vld [vmem:[%s253_s8] sm:$0xff]  ;;  %vm320_vm1 = vcmask 261120  }
  0x43   : > { %958 = vsyncadd (%p1351_p10), [#allocation6], 4294967040  ;;  %686 = vmatprep.subr.bf16.mxu0 %v995_v0  ;;  %690 = vmatprep.mubr.msk.bf16.mxu0 %vm996_vm0, %v995_v0  ;;  %v296_v4 = vpack.c.bf16 %v295_v3, %v295_v3  ;;  %v654_v5 = vld [vmem:[%s1332_s2] ss:$0 sm:$0xff]  ;;  %s1171_s26 = sshll.u32 %s1155_s14, 4  ;;  %vm365_vm2 = vcmask 60416  }
  0x44   : > { %687 = vmatpush3.bf16.msra.mxu0 %v793_v1  ;;  %s997_s28 = smov 80   ;;  %s998_s7 = smov 96  }
  0x45   : > { %688 = vmatprep.subr.bf16.mxu0 %v995_v0  ;;  %s1174_s9 = scalar_lea.vmem [#allocation7], %s1171_s26  ;;  %s999_s10 = smov 72  }
  0x46   : > { %s1000_s11 = smov 88   ;;  %s1001_s12 = smov 112  }
  0x47   : > { %s1002_s16 = smov 120   ;;  %s1003_s13 = smov 64  }
  0x48   : > { %689 = vmatpush3.bf16.msra.mxu0 %v794_v2  ;;  %s1004_s6 = smov 104   ;;  %s1005_s17 = smov 48  }
  0x49   : > { %s1006_s29 = smov 56   ;;  %s1007_s8 = smov 40  }
  0x4a   : > { %s286_s1 = scalar_lea.vmem [#allocation8], %s1171_s26 }
  0x4b   : > { %691 = vmatmul.mubr.msk.bf16.vlgmr.msra.gmra.mxu0 %vm320_vm1, %v296_v4  ;;  %s465_s25 = sshll.u32 %s286_s1, 4  ;;  %s1186_s25 = int_to_ptr.vmem [resolvable:$true] %s465_s25 }
 0x10b   : > { %v358_v6 = vpop.f32.mrf.mxu0 }
 0x10c   : > { %v359_v7 = vadd.f32 %v654_v5, %v358_v6 }
 0x10d   : > { %v692_v8 = vpop.f32.mrf.mxu0 }
 0x10e   : > { %v364_v9 = vpack.c.bf16 %v359_v7, %v359_v7 }
 0x10f   : > { %v361_v10 = vpop.f32.mrf.mxu0 }
 0x110   : > { %394 = vrot.lane.b32.xlu1 %v364_v9, %s997_s28  ;;  %385 = vrot.lane.b32.xlu0 %v364_v9, %s998_s7  ;;  %366 = vst.msk [vmem:[%s1174_s9] sm:$0xf] %vm365_vm2, %v364_v9  ;;  %s428_s28 = sand.u32 1, %s1073_s24   ;;  %s1182_s7 = sshll.u32 %s981_s21, 8 }
 0x111   : > { %v693_v11 = vpop.f32.mrf.mxu0  ;;  %s1196_s21 = scalar_lea.sflag [#allocation9], %s428_s28  ;;  %s849_s24 = scalar_lea.vmem %s1186_s25, 256 }
 0x112   : > { %p850_p4 = scmp.ne.s32.totalorder %s1186_s25, %s849_s24 }
 0x114   : > { %399 = vrot.lane.b32.xlu1 %v364_v9, %s999_s10  ;;  %389 = vrot.lane.b32.xlu0 %v364_v9, %s1000_s11  ;;  %p851_p8 = pnand %p850_p4, %p1127_p0 }
 0x116   : > { %p852_p12 = pneg %p851_p8 }
 0x118   : > { %375 = vrot.lane.b32.xlu1 %v364_v9, %s1001_s12  ;;  %370 = vrot.lane.b32.xlu0 %v364_v9, %s1002_s16  ;;  %s1192_s12 = scalar_lea.hbm %s1334_s4, %s1182_s7  ;;  %s1008_s16 = smov [#allocation8]  }
 0x11c   : > { %404 = vrot.lane.b32.xlu1 %v364_v9, %s1003_s13  ;;  %380 = vrot.lane.b32.xlu0 %v364_v9, %s1004_s6  ;;  %s853_s6 = sshll.u32 %s1008_s16, 4  ;;  %s854_s6 = int_to_ptr.vmem [resolvable:$false] %s853_s6 }
 0x11d   : > { %p856_p3 = scmp.lt.s32.totalorder %s1186_s25, %s854_s6 }
 0x120   : > { %413 = vrot.lane.b32.xlu1 %v364_v9, %s1005_s17  ;;  %408 = vrot.lane.b32.xlu0 %v364_v9, %s1006_s29  ;;  %s855_s17 = scalar_lea.vmem %s854_s6, 512 }
 0x121   : > { %p857_p5 = scmp.lt.s32.totalorder %s855_s17, %s849_s24 }
 0x123   : > { %p858_p7 = por %p857_p5, %p856_p3 }
 0x124   : > { %418 = vrot.lane.b32.xlu0 %v364_v9, %s1007_s8 }
 0x125   : > { %p859_p2 = pnand %p858_p7, %p852_p12 }
 0x182   : > { %v395_v12 = vpop.permute.xlu1 %394  ;;  %v386_v13 = vpop.permute.xlu0 %385 }
 0x183   : > { %663 = vst.msk [vmem:[%s286_s1 + $0x8] sm:$0xf] %vm365_vm2, %v395_v12  ;;  %388 = vst.msk [vmem:[%s286_s1] sm:$0xf] %vm365_vm2, %v386_v13 }
 0x186   : > { %v400_v14 = vpop.permute.xlu1 %399  ;;  %v390_v15 = vpop.permute.xlu0 %389 }
 0x187   : > { %664 = vst.msk [vmem:[%s286_s1 + $0xc] sm:$0xf] %vm365_vm2, %v400_v14  ;;  %662 = vst.msk [vmem:[%s286_s1 + $0x4] sm:$0xf] %vm365_vm2, %v390_v15 }
 0x188   : > { %862 = shalt.err (!%p859_p2)
}
 0x189   : > { %s863_s29 = scalar_lea.hbm %s1192_s12, 256  ;;  %s867_s28 = scalar_lea.hbm %s1334_s4, 512 }
 0x18a   : > { %p864_p6 = scmp.ne.s32.totalorder %s1192_s12, %s863_s29  ;;  %p868_p11 = scmp.lt.s32.totalorder %s1192_s12, %s1334_s4 }
 0x18b   : > { %p869_p1 = scmp.lt.s32.totalorder %s867_s28, %s863_s29 }
 0x18c   : > { %p865_p9 = pnand %p864_p6, %p1127_p0 }
 0x18d   : > { %p870_p10 = por %p869_p1, %p868_p11 }
 0x18e   : > { %p866_p13 = pneg %p865_p9 }
 0x190   : > { %p871_p4 = pnand %p870_p10, %p866_p13 }
 0x192   : > { %874 = shalt.err (!%p871_p4)
}
 0x193   : > { %s1009_s24 = smov 4   ;;  %s448_s16 = sshll.u32 %s1174_s9, 4  ;;  %v376_v16 = vpop.permute.xlu1 %375  ;;  %v371_v17 = vpop.permute.xlu0 %370  ;;  %s1227_s16 = int_to_ptr.vmem [resolvable:$true] %s448_s16 }
 0x194   : > { %701 = dma.vmem_to_hbm [thread:$0]  (%p1127_p0), %s1186_s25, 256, %s1192_s12, %s1196_s21, %s1003_s13, %s1003_s13, %s1009_s24  }
 0x195   : > { %660 = vst.msk [vmem:[%s1174_s9 + $0x8] sm:$0xf] %vm365_vm2, %v376_v16  ;;  %659 = vst.msk [vmem:[%s1174_s9 + $0x4] sm:$0xf] %vm365_vm2, %v371_v17  ;;  %s1233_s29 = scalar_lea.hbm %s1333_s3, %s1182_s7  ;;  %s1236_s25 = scalar_lea.vmem [#allocation10], %s1171_s26 }
 0x196   : > { %s424_s12 = scalar_lea.sflag [#allocation4], %s1155_s14  ;;  %s875_s8 = scalar_lea.vmem %s1227_s16, 256 }
 0x197   : > { %v405_v18 = vpop.permute.xlu1 %404  ;;  %v381_v19 = vpop.permute.xlu0 %380  ;;  %p876_p8 = scmp.ne.s32.totalorder %s1227_s16, %s875_s8  ;;  %s1010_s1 = smov [#allocation7]  }
 0x198   : > { %407 = vst.msk [vmem:[%s1236_s25] sm:$0xf] %vm365_vm2, %v405_v18  ;;  %661 = vst.msk [vmem:[%s1174_s9 + $0xc] sm:$0xf] %vm365_vm2, %v381_v19  ;;  %s879_s28 = sshll.u32 %s1010_s1, 4  ;;  %s880_s28 = int_to_ptr.vmem [resolvable:$false] %s879_s28 }
 0x199   : > { %p877_p12 = pnand %p876_p8, %p1127_p0  ;;  %s881_s10 = scalar_lea.vmem %s880_s28, 512 }
 0x19a   : > { %p882_p5 = scmp.lt.s32.totalorder %s1227_s16, %s880_s28  ;;  %p883_p7 = scmp.lt.s32.totalorder %s881_s10, %s875_s8 }
 0x19b   : > { %p878_p3 = pneg %p877_p12 }
 0x19c   : > { %p884_p2 = por %p883_p7, %p882_p5 }
 0x19e   : > { %p885_p6 = pnand %p884_p2, %p878_p3 }
 0x1a0   : > { %888 = shalt.err (!%p885_p6)
}
 0x1a1   : > { %s889_s26 = scalar_lea.hbm %s1233_s29, 256  ;;  %s893_s11 = scalar_lea.hbm %s1333_s3, 512 }
 0x1a2   : > { %p890_p9 = scmp.ne.s32.totalorder %s1233_s29, %s889_s26  ;;  %p894_p1 = scmp.lt.s32.totalorder %s1233_s29, %s1333_s3 }
 0x1a3   : > { %p895_p10 = scmp.lt.s32.totalorder %s893_s11, %s889_s26 }
 0x1a4   : > { %p891_p13 = pnand %p890_p9, %p1127_p0 }
 0x1a5   : > { %p896_p4 = por %p895_p10, %p894_p1 }
 0x1a6   : > { %p892_p11 = pneg %p891_p13 }
 0x1a8   : > { %p897_p8 = pnand %p896_p4, %p892_p11 }
 0x1aa   : > { %900 = shalt.err (!%p897_p8)
}
 0x1ab   : > { %700 = dma.vmem_to_hbm [thread:$0]  (%p1127_p0), %s1227_s16, 256, %s1233_s29, %s424_s12, %s1003_s13, %s1003_s13, %s1009_s24   ;;  %v414_v20 = vpop.permute.xlu1 %413  ;;  %v409_v21 = vpop.permute.xlu0 %408 }
 0x1ac   : > { %s482_s8 = sshll.u32 %s1236_s25, 4  ;;  %666 = vst.msk [vmem:[%s1236_s25 + $0x8] sm:$0xf] %vm365_vm2, %v414_v20  ;;  %665 = vst.msk [vmem:[%s1236_s25 + $0x4] sm:$0xf] %vm365_vm2, %v409_v21  ;;  %s1277_s10 = scalar_lea.hbm %s1335_s5, %s1182_s7  ;;  %s1271_s8 = int_to_ptr.vmem [resolvable:$true] %s482_s8 }
 0x1ad   : > { %s901_s16 = scalar_lea.vmem %s1271_s8, 256  ;;  %s1011_s29 = smov [#allocation10]  }
 0x1ae   : > { %p902_p12 = scmp.ne.s32.totalorder %s1271_s8, %s901_s16  ;;  %s905_s12 = sshll.u32 %s1011_s29, 4  ;;  %s906_s12 = int_to_ptr.vmem [resolvable:$false] %s905_s12 }
 0x1af   : > { %v419_v22 = vpop.permute.xlu0 %418  ;;  %s907_s26 = scalar_lea.vmem %s906_s12, 512  ;;  %p908_p7 = scmp.lt.s32.totalorder %s1271_s8, %s906_s12 }
 0x1b0   : > { %667 = vst.msk [vmem:[%s1236_s25 + $0xc] sm:$0xf] %vm365_vm2, %v419_v22  ;;  %p903_p3 = pnand %p902_p12, %p1127_p0  ;;  %p909_p2 = scmp.lt.s32.totalorder %s907_s26, %s901_s16 }
 0x1b2   : > { %p904_p5 = pneg %p903_p3  ;;  %p910_p6 = por %p909_p2, %p908_p7 }
 0x1b4   : > { %p911_p9 = pnand %p910_p6, %p904_p5 }
 0x1b6   : > { %914 = shalt.err (!%p911_p9)
}
 0x1b7   : > { %s915_s7 = scalar_lea.hbm %s1277_s10, 256  ;;  %s919_s9 = scalar_lea.hbm %s1335_s5, 512 }
 0x1b8   : > { %p916_p13 = scmp.ne.s32.totalorder %s1277_s10, %s915_s7  ;;  %p920_p10 = scmp.lt.s32.totalorder %s1277_s10, %s1335_s5 }
 0x1b9   : > { %p921_p4 = scmp.lt.s32.totalorder %s919_s9, %s915_s7 }
 0x1ba   : > { %p917_p11 = pnand %p916_p13, %p1127_p0 }
 0x1bb   : > { %p922_p8 = por %p921_p4, %p920_p10 }
 0x1bc   : > { %p918_p1 = pneg %p917_p11 }
 0x1be   : > { %p923_p12 = pnand %p922_p8, %p918_p1 }
 0x1c0   : > { %926 = shalt.err (!%p923_p12)
}
 0x1c1   : > { %702 = dma.vmem_to_hbm [thread:$0]  (%p1127_p0), %s1271_s8, 256, %s1277_s10, %s1196_s21, %s1003_s13, %s1003_s13, %s1009_s24  }
 0x1c2 PF: > { %s497_s17 = sand.u32 1, %s969_s18   ;;  %p1352_p3 = scmp.ne.s32.totalorder %s1341_s27, 0 }
 0x1c3   : > { %p1353_p5 = scmp.ge.s32.totalorder %s989_s23, 2  ;;  %s498_s1 = scalar_lea.sflag [#allocation4], %s497_s17 }
 0x1c5   : > { %p715_p7 = pnand %p1353_p5, %p1352_p3 }
 0x1c7   : > { %p716_p2 = pneg %p715_p7 }
 0x1c9   : > { %960 = dma.done.wait (%p716_p2), %s498_s1, 256  }
 0x1ca   : > { %962 = vsyncadd (%p716_p2), %s498_s1, 4294967040  ;;  %s1354_s15 = sadd.s32 4294967294, %s989_s23  }
 0x1cb   : > { %s506_s28 = sand.u32 1, %s1354_s15  }
 0x1cc   : > { %s507_s16 = scalar_lea.sflag [#allocation9], %s506_s28 }
 0x1cd   : > { %964 = dma.done.wait (%p716_p2), %s507_s16, 512  }
 0x1ce   : > { %966 = vsyncadd (%p716_p2), %s507_s16, 4294966784  ;;  %s26_s23 = sadd.s32 1, %s989_s23   ;;  %s1355_s27 = sld [smem:[#allocation15_spill]] }
 0x1cf   : > { %p23_p0 = scmp.ge.s32.totalorder %s26_s23, 4   ;;  %s1356_s18 = smov %s973_s19 }
 0x1d0   : > { %s1357_s19 = smov %s977_s20  ;;  %s1358_s20 = smov %s1136_s30 }
 0x1d1   : > { %s1359_s21 = smov %s985_s22  ;;  %25 = sbr.rel (!%p23_p0) target bundleno = 11 (0xb), region = 122 }
 0x1d4   : > { %s1360_s22 = smov %s1355_s27 }
 0x1d6   :  { %521 = vsyncpa [#allocation3], 1 }
 0x1d7   :  { %523 = vsyncpa [#allocation3 + $0x1], 1 }
 0x1d8   :  { %524 = vsyncpa [#allocation6], 1 }
 0x1d9   :  { %525 = vsyncpa [#allocation4], 1 }
 0x1da   :  { %527 = vsyncpa [#allocation4 + $0x1], 1 }
 0x1db   :  { %528 = vsyncpa [#allocation9], 1 }
 0x1dc   :  { %530 = vsyncpa [#allocation9 + $0x1], 1 }

</bundles_post_ra>
